<compile_context>
chip_gen: v5e
topology: v5e:2x2
jax: 0.10.0
libtpu: 0.0.40
codegen_flags: <defaults>
</compile_context>

<pallas_src>
import jax
import jax.numpy as jnp
from jax.experimental import pallas as pl
from jax.experimental.pallas import tpu as pltpu


def _round_up(x, m):
    return ((x + m - 1) // m) * m


def _make_kernel(n_valid, tile_rows, use_mxu_reduce):
    """Builds the kernel body closed over static (trace-time) scalars."""

    def kernel(out_ref, tgt_ref, w_ref, partial_ref):
        pid = pl.program_id(0)

        x = out_ref[...].astype(jnp.float32)      # (R, C) logits
        t = tgt_ref[...]                          # (R, 1) int32 targets
        w = w_ref[...].astype(jnp.float32)        # (1, C) class weights

        # Numerically stable per-row logsumexp.
        m = jnp.max(x, axis=1, keepdims=True)                       # (R, 1) XLU
        p = jnp.exp(x - m)                                          # (R, C) EUP
        if use_mxu_reduce:
            # Big lane reduction on the otherwise-idle MXU.
            ones_c = jnp.ones((x.shape[1], 1), jnp.float32)
            s = jnp.dot(p, ones_c, preferred_element_type=jnp.float32)
        else:
            s = jnp.sum(p, axis=1, keepdims=True)
        lse = m + jnp.log(s)                                        # (R, 1)

        # Fused masked gather: one select + one lane reduce yields
        #   w[t_i] * (logsumexp_i - x[i, t_i])   with no (R,C) one-hot temp.
        cols = jax.lax.broadcasted_iota(jnp.int32, x.shape, 1)
        contrib = jnp.where(cols == t, w * (lse - x), 0.0)          # (R, C)
        row_loss = jnp.sum(contrib, axis=1, keepdims=True)          # (R, 1)

        # Mask rows past the true N (ragged last block's garbage, incl. any
        # NaN/Inf it produced, is zeroed here — must stay AFTER row_loss).
        rows = pid * tile_rows + jax.lax.broadcasted_iota(
            jnp.int32, row_loss.shape, 0)
        row_loss = jnp.where(rows < n_valid, row_loss, 0.0)

        # Per-tile partial sum; global reduction + normalization in wrapper.
        partial_ref[...] = jnp.sum(row_loss, axis=0, keepdims=True)  # (1, 1)

    return kernel


def customized_cross_entropy_loss(outputs, targets, weight, *, block_rows=None):
    """outputs: (N, C) f32/bf16 logits, targets: (N,) ints, weight: (C,) -> f32 scalar."""
    n, c = outputs.shape
    itemsize = jnp.dtype(outputs.dtype).itemsize
    sublane = max(8, 32 // max(itemsize, 1))          # 8 for f32, 16 for bf16

    # VMEM-budget-driven row tile: ~2 MiB per logits buffer, <= 1024 rows,
    # rounded to the dtype's sublane multiple, never larger than needed for N.
    rows_budget = max((2 << 20) // (c * itemsize), sublane)
    tile_rows = min(rows_budget, 1024)
    if block_rows is not None:
        tile_rows = min(tile_rows, block_rows)
    tile_rows = min(tile_rows, _round_up(n, sublane))
    tile_rows = max(sublane, (tile_rows // sublane) * sublane)

    num_tiles = pl.cdiv(n, tile_rows)                 # ragged last block OK

    targets2d = targets.astype(jnp.int32).reshape(-1, 1)       # (N, 1)
    weight2d = weight.astype(jnp.float32).reshape(1, -1)       # (1, C)

    kernel = _make_kernel(n, tile_rows, use_mxu_reduce=(c >= 128))

    # Explicit scoped-VMEM limit: double-buffered logits + f32 temporaries,
    # with headroom, capped at 64 MiB (fits v7x physical VMEM).
    est = (2 * tile_rows * c * itemsize      # logits double buffer
           + 8 * tile_rows * c * 4           # f32 intermediates (generous)
           + 4 * tile_rows * 4 + 4 * c * 4)  # targets / weights buffers
    vmem_limit = int(min(max(est + (4 << 20), 16 << 20), 64 << 20))

    cost = pl.CostEstimate(
        flops=6 * n * c,
        transcendentals=n * c + n,                    # exp + log
        bytes_accessed=n * c * itemsize + n * 4 + c * 4 + num_tiles * 4,
    )

    partials = pl.pallas_call(
        kernel,
        out_shape=jax.ShapeDtypeStruct((num_tiles, 1, 1), jnp.float32),
        grid=(num_tiles,),
        in_specs=[
            # Logits: streamed row tiles (auto double-buffered pipeline).
            pl.BlockSpec((tile_rows, c), lambda i: (i, 0)),
            # Targets: one (tile_rows, 1) int32 column per tile.
            pl.BlockSpec((tile_rows, 1), lambda i: (i, 0)),
            # Class weights: constant block index -> loaded once, resident.
            pl.BlockSpec((1, c), lambda i: (0, 0)),
        ],
        # One (1,1) partial per tile; leading axis squeezed inside the kernel.
        out_specs=pl.BlockSpec((None, 1, 1), lambda i: (i, 0, 0)),
        compiler_params=pltpu.CompilerParams(
            # Independent row tiles -> megacore-shardable on v7x.
            dimension_semantics=("parallel",),
            vmem_limit_bytes=vmem_limit,
        ),
        cost_estimate=cost,
    )(outputs, targets2d, weight2d)

    # Tiny (num_tiles,) reduction + global N*C normalization.
    return jnp.sum(partials) * jnp.float32(1.0 / (n * c))


def _reference(outputs, targets, weight):
    outputs = outputs.astype(jnp.float32)
    onehot = jax.nn.one_hot(targets, outputs.shape[1], dtype=jnp.float32)
    log_p = jax.nn.log_softmax(outputs, axis=1)
    loss = -onehot * log_p
    return jnp.mean(weight.astype(jnp.float32).reshape(1, -1) * loss)


if __name__ == "__main__":
    key = jax.random.PRNGKey(0)

    # Shapes/values mirroring the module's example usage: N=2 rows, C=3 classes.
    weight = jnp.array([1.0, 5.0, 10.0], dtype=jnp.float32)
    outputs = jnp.array([[0.9, 0.5, 0.05],
                         [0.01, 0.2, 0.7]], dtype=jnp.float32)
    targets = jnp.array([0, 1], dtype=jnp.int32)

    # Larger case exercising multi-tile + ragged-last-block masking (37 = 16+16+5).
    k1, k2, k3, k4, k5, k6 = jax.random.split(key, 6)
    n_big, c_big = 37, 5
    outputs_big = jax.random.normal(k1, (n_big, c_big), dtype=jnp.float32)
    targets_big = jax.random.randint(k2, (n_big,), 0, c_big, dtype=jnp.int32)
    weight_big = jax.random.uniform(k3, (c_big,), dtype=jnp.float32,
                                    minval=0.5, maxval=2.0)

    # Wider case exercising the MXU exp-sum path (C >= 128), ragged tiles (64 = 24+24+16).
    n_w, c_w = 64, 256
    outputs_w = jax.random.normal(k4, (n_w, c_w), dtype=jnp.float32)
    targets_w = jax.random.randint(k5, (n_w,), 0, c_w, dtype=jnp.int32)
    weight_w = jax.random.uniform(k6, (c_w,), dtype=jnp.float32,
                                  minval=0.5, maxval=2.0)

    loss = customized_cross_entropy_loss(outputs, targets, weight)
    loss_bf16 = customized_cross_entropy_loss(
        outputs.astype(jnp.bfloat16), targets, weight)
    loss_big = customized_cross_entropy_loss(
        outputs_big, targets_big, weight_big, block_rows=16)
    loss_w = customized_cross_entropy_loss(
        outputs_w, targets_w, weight_w, block_rows=24)
    jax.block_until_ready((loss, loss_bf16, loss_big, loss_w))

    ref = _reference(outputs, targets, weight)
    ref_bf16 = _reference(outputs.astype(jnp.bfloat16), targets, weight)
    ref_big = _reference(outputs_big, targets_big, weight_big)
    ref_w = _reference(outputs_w, targets_w, weight_w)

    assert jnp.allclose(loss, ref, atol=1e-5, rtol=1e-5), (loss, ref)
    assert jnp.allclose(loss_bf16, ref_bf16, atol=1e-5, rtol=1e-5), (loss_bf16, ref_bf16)
    assert jnp.allclose(loss_big, ref_big, atol=1e-5, rtol=1e-5), (loss_big, ref_big)
    assert jnp.allclose(loss_w, ref_w, atol=1e-5, rtol=1e-5), (loss_w, ref_w)

    print("KERNEL_OK")
</pallas_src>

<mosaic_0001>
module attributes {stable_mosaic.version = 11 : i64} {
  func.func @kernel(%arg0: i32, %arg1: memref<8x3xf32, #tpu.memory_space<vmem>>, %arg2: memref<8x1xi32, #tpu.memory_space<vmem>>, %arg3: memref<1x3xf32, #tpu.memory_space<vmem>>, %arg4: memref<1x1x1xf32, #tpu.memory_space<vmem>>) attributes {dimension_semantics = [#tpu.dimension_semantics<parallel>], iteration_bounds = array<i64: 1>, scalar_prefetch = 0 : i64, scratch_operands = 0 : i64, tpu.core_type = #tpu.core_type<tc>, window_params = [{transform_indices = @transform_0, window_bounds = array<i64: 8, 3>}, {transform_indices = @transform_1, window_bounds = array<i64: 8, 1>}, {pipeline_mode = #tpu.pipeline_mode<synchronous>, transform_indices = @transform_2, window_bounds = array<i64: 1, 3>}, {transform_indices = @transform_3, window_bounds = array<i64: 1, 1, 1>}]} {
    %c0 = arith.constant 0 : index
    %c0_0 = arith.constant 0 : index
    %0 = vector.load %arg1[%c0, %c0_0] : memref<8x3xf32, #tpu.memory_space<vmem>>, vector<8x3xf32>
    %c0_1 = arith.constant 0 : index
    %c0_2 = arith.constant 0 : index
    %1 = vector.load %arg2[%c0_1, %c0_2] : memref<8x1xi32, #tpu.memory_space<vmem>>, vector<8x1xi32>
    %c0_3 = arith.constant 0 : index
    %c0_4 = arith.constant 0 : index
    %2 = vector.load %arg3[%c0_3, %c0_4] : memref<1x3xf32, #tpu.memory_space<vmem>>, vector<1x3xf32>
    %cst = arith.constant dense<0xFF800000> : vector<8xf32>
    %3 = vector.multi_reduction <maximumf>, %0, %cst [1] : vector<8x3xf32> to vector<8xf32>
    %4 = vector.shape_cast %3 : vector<8xf32> to vector<8x1xf32>
    %5 = vector.broadcast %4 : vector<8x1xf32> to vector<8x3xf32>
    %6 = arith.subf %0, %5 : vector<8x3xf32>
    %7 = math.exp %6 : vector<8x3xf32>
    %cst_5 = arith.constant dense<0.000000e+00> : vector<8xf32>
    %8 = vector.multi_reduction <add>, %7, %cst_5 [1] : vector<8x3xf32> to vector<8xf32>
    %9 = vector.shape_cast %8 : vector<8xf32> to vector<8x1xf32>
    %10 = math.log %9 : vector<8x1xf32>
    %11 = arith.addf %4, %10 : vector<8x1xf32>
    %12 = tpu.iota {dimensions = array<i32: 1>} : vector<8x3xi32>
    %13 = vector.broadcast %1 : vector<8x1xi32> to vector<8x3xi32>
    %14 = arith.cmpi eq, %12, %13 : vector<8x3xi32>
    %15 = vector.broadcast %11 : vector<8x1xf32> to vector<8x3xf32>
    %16 = arith.subf %15, %0 : vector<8x3xf32>
    %17 = vector.broadcast %2 : vector<1x3xf32> to vector<8x3xf32>
    %18 = arith.mulf %17, %16 : vector<8x3xf32>
    %cst_6 = arith.constant 0.000000e+00 : f32
    %19 = vector.broadcast %cst_6 : f32 to vector<8x3xf32>
    %20 = arith.select %14, %18, %19 : vector<8x3xi1>, vector<8x3xf32>
    %cst_7 = arith.constant dense<0.000000e+00> : vector<8xf32>
    %21 = vector.multi_reduction <add>, %20, %cst_7 [1] : vector<8x3xf32> to vector<8xf32>
    %22 = vector.shape_cast %21 : vector<8xf32> to vector<8x1xf32>
    %c8_i32 = arith.constant 8 : i32
    %23 = arith.muli %arg0, %c8_i32 : i32
    %24 = tpu.iota {dimensions = array<i32: 0>} : vector<8x1xi32>
    %25 = vector.broadcast %23 : i32 to vector<8x1xi32>
    %26 = arith.addi %25, %24 : vector<8x1xi32>
    %c2_i32 = arith.constant 2 : i32
    %27 = vector.broadcast %c2_i32 : i32 to vector<8x1xi32>
    %28 = arith.cmpi slt, %26, %27 : vector<8x1xi32>
    %cst_8 = arith.constant 0.000000e+00 : f32
    %29 = vector.broadcast %cst_8 : f32 to vector<8x1xf32>
    %30 = arith.select %28, %22, %29 : vector<8x1xi1>, vector<8x1xf32>
    %cst_9 = arith.constant dense<0.000000e+00> : vector<1xf32>
    %31 = vector.multi_reduction <add>, %30, %cst_9 [0] : vector<8x1xf32> to vector<1xf32>
    %32 = vector.shape_cast %31 : vector<1xf32> to vector<1x1xf32>
    %c0_10 = arith.constant 0 : index
    %c0_11 = arith.constant 0 : index
    %c0_12 = arith.constant 0 : index
    %33 = vector.load %arg4[%c0_10, %c0_11, %c0_12] : memref<1x1x1xf32, #tpu.memory_space<vmem>>, vector<1x1x1xf32>
    %34 = vector.shape_cast %33 : vector<1x1x1xf32> to vector<1x1xf32>
    %35 = vector.shape_cast %32 : vector<1x1xf32> to vector<1x1x1xf32>
    tpu.vector_store %arg4[%c0_10, %c0_11, %c0_12], %35 {strides = array<i32>} : memref<1x1x1xf32, #tpu.memory_space<vmem>>, vector<1x1x1xf32>,
    return
  }
  func.func @transform_0(%arg0: i32) -> (i32, i32) {
    %c0_i32 = arith.constant 0 : i32
    %c0_i32_0 = arith.constant 0 : i32
    return %arg0, %c0_i32 : i32, i32
  }
  func.func @transform_1(%arg0: i32) -> (i32, i32) {
    %c0_i32 = arith.constant 0 : i32
    %c0_i32_0 = arith.constant 0 : i32
    return %arg0, %c0_i32 : i32, i32
  }
  func.func @transform_2(%arg0: i32) -> (i32, i32) {
    %c0_i32 = arith.constant 0 : i32
    %c0_i32_0 = arith.constant 0 : i32
    %c0_i32_1 = arith.constant 0 : i32
    return %c0_i32, %c0_i32_0 : i32, i32
  }
  func.func @transform_3(%arg0: i32) -> (i32, i32, i32) {
    %c0_i32 = arith.constant 0 : i32
    %c0_i32_0 = arith.constant 0 : i32
    %c0_i32_1 = arith.constant 0 : i32
    return %arg0, %c0_i32, %c0_i32_0 : i32, i32, i32
  }
}

</mosaic_0001>

<bundles_post_ra>
// kernel: tpu_custom_call.1
= control target key start
LH: loop header
LB: loop body
LE: loop exit
PB: predicated region body
PF: predicated region fallthrough
CT: control target
= control target key end

     0   :  { %vm18_vm0 = vcmask 23552   ;;  %s149_s0 = inlined_call_operand.vmem [shape: f32[2,3], index: 0, kind: input, shape index: {}]   ;;  %s150_s1 = inlined_call_operand.vmem [shape: s32[2,1], index: 1, kind: input, shape index: {}]   ;;  %s151_s2 = inlined_call_operand.vmem [shape: f32[1,3], index: 2, kind: input, shape index: {}]   ;;  %s152_s3 = inlined_call_operand.hbm [shape: f32[1,1,1], index: 3, kind: output, shape index: {}]  }
   0x1   :  { %v15_v0 = vld [vmem:[%s149_s0] sm:$0xff] }
   0x2   :  { %8 = vsyncpa [#allocation3], 0  ;;  %v19_v1 = vsel %vm18_vm0, %v15_v0, -inf  ;;  %v16_v2 = vld [vmem:[%s150_s1] sm:$0xff]  ;;  %v112_v3 = vmov 0   ;;  %v31_v10 = vlaneseq  ;;  %s113_s16 = smov [#allocation2]  }
   0x3   :  { %20 = vmax.xlane.f32.xlu0 %v19_v1  ;;  %79 = vset.pattern.permute.xlu1 %v112_v3  ;;  %v81_v16 = vld [vmem:[%s151_s2] ss:$0 sm:$0xff]  ;;  %s66_s17 = sshll.u32 %s113_s16, 4  ;;  %s68_s2 = sshll.u32 %s152_s3, 4  ;;  %vm59_vm3 = vcmask 0   ;;  %s67_s17 = int_to_ptr.vmem [resolvable:$true] %s66_s17  ;;  %s69_s2 = int_to_ptr.hbm [resolvable:$true] %s68_s2 }
   0x4   :  { %80 = vset.pattern.permute.xlu0 %v112_v3  ;;  %34 = vperm.xlu1 %79, %v16_v2   ;;  %v32_v13 = vand.u32 127, %v31_v10  ;;  %v48_v21 = vshrl.u32 %v31_v10, 7 }
   0x6   :  { %vm51_vm2 = vcmp.lt.s32.totalorder %v48_v21, 2 }
  0x76   :  { %v21_v4 = vpop.xlane.xlu0 %20  ;;  %v35_v15 = vpop.permute.xlu1 %34 }
  0x77   :  { %v22_v5 = vsub.f32 %v15_v0, %v21_v4  ;;  %vm36_vm1 = vcmp.eq.s32.totalorder %v32_v13, %v35_v15 }
  0x79   :  { %v23_v6 = vmul.f32 1.442695, %v22_v5 }
  0x7b   :  { %82 = vpow2.f32 %v23_v6 }
  0x81   :  { %v83_v7 = vpop.eup %82 }
  0x82   :  { %v25_v8 = vsel %vm18_vm0, %v83_v7, 0.0 }
  0x83   :  { %26 = vadd.xlane.f32.xlu0 %v25_v8 }
  0xf6   :  { %v27_v9 = vpop.xlane.xlu0 %26 }
  0xf7   :  { %84 = vlog2.f32 %v27_v9 }
  0xfd   :  { %v85_v11 = vpop.eup %84 }
  0xfe   :  { %v29_v12 = vmul.f32 0.6931472, %v85_v11 }
 0x100   :  { %v30_v14 = vadd.f32 %v29_v12, %v21_v4 }
 0x102   :  { %v37_v17 = vsub.f32 %v30_v14, %v15_v0 }
 0x104   :  { %v41_v18 = vmul.f32 %v81_v16, %v37_v17 }
 0x106   :  { %v42_v19 = vsel %vm36_vm1, %v41_v18, 0.0 }
 0x107   :  { %v43_v20 = vsel %vm18_vm0, %v42_v19, 0.0 }
 0x108   :  { %44 = vadd.xlane.f32.xlu1 %v43_v20 }
 0x17b   :  { %v45_v22 = vpop.xlane.xlu1 %44 }
 0x17c   :  { %v52_v23 = vsel %vm51_vm2, %v45_v22, 0.0 }
 0x17d   :  { %v53_v24 = vrot.slane %v52_v23, 4 }
 0x17f   :  { %v54_v25 = vadd.f32 %v53_v24, %v52_v23 }
 0x181   :  { %v55_v26 = vrot.slane %v54_v25, 2 }
 0x183   :  { %v56_v27 = vadd.f32 %v55_v26, %v54_v25 }
 0x185   :  { %v57_v28 = vrot.slane %v56_v27, 1 }
 0x187   :  { %v58_v29 = vadd.f32 %v57_v28, %v56_v27 }
 0x189   :  { %60 = vst.msk [vmem:[#allocation2] sm:$0x1] %vm59_vm3, %v58_v29 }
 0x18a   :  { %71 = dma.vmem_to_hbm [thread:$0]  %s67_s17, 16, %s69_s2, [#allocation3]  }
 0x18b   :  { %110 = dma.done.wait [#allocation3], 16  }
 0x18c   :  { %111 = vsyncadd [#allocation3], 4294967280 }
 0x18d   :  { %76 = vsyncpa [#allocation3], 1 }

</bundles_post_ra>
